<compile_context>
chip_gen: v7x
topology: tpu7x:2x2x1
jax: 0.10.0
libtpu: 0.0.40
codegen_flags: <defaults>
</compile_context>

<pallas_src>
import jax
import jax.numpy as jnp
from jax.experimental import pallas as pl
from jax.experimental.pallas import tpu as pltpu


def _cdiv(a, b):
    return -(-a // b)


def _round_up(v, m):
    return _cdiv(v, m) * m


def _pick_tb(B, cap=4096):
    """Batch-tile size (rows per grid step), always a multiple of 8.

    Targets ~4 grid steps, keeps blocks >= ~1024 rows (~1 MB of x) when the batch is
    large enough, never exceeds `cap` rows (double-buffered x ~8 MB at the cap, under
    v5e's 16 MiB scoped-VMEM default and far under v6e/v7x defaults), and guarantees
    >= 2 grid steps when B allows so both v7x TensorCores get work.  B does NOT have
    to be divisible by TB: the grid uses cdiv and the last block may be partial.
    """
    b8 = _round_up(B, 8)
    tb = _round_up(_cdiv(B, 4), 8)            # aim for ~4 pipeline steps
    tb = max(tb, min(1024, b8))               # but keep blocks >= ~1 MB of x
    if b8 > 8:
        tb = min(tb, _round_up(_cdiv(B, 2), 8))   # >= 2 steps (v7x megacore)
    return max(8, min(tb, cap, b8))


def _make_kernel(n_boxes, box_dim, masked):
    N, D = n_boxes, box_dim

    def kernel(*refs):
        if masked:
            x_ref, wseg_ref, m_ref, o_ref = refs
        else:
            x_ref, wseg_ref, o_ref = refs

        x = x_ref[...]                                  # (TB, N*D) f32, lane-dense
        t = jnp.tanh(x)                                 # EUP

        # scores[b, n] = sum_d tanh(x[b, n, d]) * w[d].  Linear bias dropped: softmax is
        # shift-invariant, so a scalar added to every score is an exact no-op.
        scores = jnp.dot(t, wseg_ref[...],
                         preferred_element_type=jnp.float32)          # (TB, N)

        mx = jnp.max(scores, axis=-1, keepdims=True)
        e = jnp.exp(scores - mx)
        # Fused masked renorm: (e*mask)/sum(e*mask) == (softmax*mask)/sum(softmax*mask).
        num = e * m_ref[...] if masked else e                          # (TB, N)
        denom = jnp.sum(num, axis=-1, keepdims=True)                   # (TB, 1)
        # All-zero mask row -> denom == 0 -> inf/NaN, same as the reference's 0/0.
        inv = pl.reciprocal(denom, approx=True)                        # EUP slot

        # att[b, d] = (sum_n num[b, n] * x[b, n*D + d]) * inv[b]   (ORIGINAL x, not tanh).
        # Unrolled VPU accumulation over the N segments replaces the previous two f32
        # selector matmuls, leaving only one MXU pass (the scores matvec above).
        acc = num[:, 0:1] * x[:, 0:D]
        for n in range(1, N):
            acc = acc + num[:, n:n + 1] * x[:, n * D:(n + 1) * D]
        o_ref[...] = (acc * inv).astype(o_ref.dtype)

    return kernel


def attention_forward(att_feats, w, bias=None, att_masks=None):
    """att_feats: (B, N, D) f32.
    w: alpha_net weight with D elements (e.g. PyTorch nn.Linear weight of shape (1, D)).
    bias: accepted for API parity; a scalar shift of all scores cancels in softmax,
          so it is not used inside the kernel (mathematically exact).
    att_masks: optional (B, N). Returns (B, D)."""
    del bias  # softmax shift-invariance: exact no-op on the output
    B, N, D = att_feats.shape
    ND = N * D
    f32 = jnp.float32

    x2 = att_feats.reshape(B, ND)                                    # zero-cost reshape
    w_col = jnp.reshape(w, (D, 1)).astype(f32)
    wseg = jnp.kron(jnp.eye(N, dtype=f32), w_col)                    # (N*D, N) selector

    TB = _pick_tb(B)
    grid = (_cdiv(B, TB),)

    x_spec = pl.BlockSpec((TB, ND), lambda i: (i, 0))
    wseg_spec = pl.BlockSpec((ND, N), lambda i: (0, 0))
    o_spec = pl.BlockSpec((TB, D), lambda i: (i, 0))

    masked = att_masks is not None
    if masked:
        mask = att_masks.reshape(B, N).astype(f32)
        in_specs = [x_spec, wseg_spec, pl.BlockSpec((TB, N), lambda i: (i, 0))]
        args = (x2, wseg, mask)
    else:
        # Dedicated no-mask variant: no all-ones mask stream is DMA'd.
        in_specs = [x_spec, wseg_spec]
        args = (x2, wseg)

    return pl.pallas_call(
        _make_kernel(N, D, masked),
        out_shape=jax.ShapeDtypeStruct((B, D), att_feats.dtype),
        grid_spec=pltpu.PrefetchScalarGridSpec(
            num_scalar_prefetch=0,
            grid=grid,
            in_specs=in_specs,
            out_specs=o_spec,
        ),
        compiler_params=pltpu.CompilerParams(
            dimension_semantics=("parallel",)),
    )(*args)


def _reference(att_feats, w, bias, att_masks=None):
    # Pure-JAX reference mirroring the PyTorch forward (bias included).
    B, N, D = att_feats.shape
    dot = jnp.tanh(att_feats).reshape(B * N, D)
    dot = dot @ jnp.reshape(w, (D, 1)) + jnp.reshape(bias, (1, 1))
    dot = dot.reshape(B, N)
    weight = jax.nn.softmax(dot, axis=1)
    if att_masks is not None:
        weight = weight * att_masks.reshape(B, N).astype(jnp.float32)
        weight = weight / jnp.sum(weight, axis=1, keepdims=True)
    return jnp.einsum("bn,bnd->bd", weight, att_feats)


if __name__ == "__main__":
    N, D = 8, 32
    key = jax.random.PRNGKey(0)
    k_x, k_w, k_b, k_m, k_x2, k_m2 = jax.random.split(key, 6)

    # alpha_net = nn.Linear(box_emb_size, 1): weight (1, D), bias (1,)
    w = jax.random.normal(k_w, (1, D), dtype=jnp.float32) / jnp.sqrt(D)
    bias = jax.random.normal(k_b, (1,), dtype=jnp.float32) * 0.1

    # Tolerance: approx-reciprocal normalization + dropped (softmax-invariant) bias
    # introduce ~1e-4 relative perturbation; use 2e-3 for margin.
    TOL = 2e-3

    # Case 1: tiny batch (single partial block), no-mask and masked paths.
    B = 2
    x = jax.random.normal(k_x, (B, N, D), dtype=jnp.float32)
    masks = (jax.random.uniform(k_m, (B, N)) > 0.2).astype(jnp.float32)
    masks = masks.at[:, 0].set(1.0)  # guarantee >=1 valid box (sane inputs)

    out = jax.block_until_ready(attention_forward(x, w, bias, att_masks=None))
    ref = _reference(x, w, bias, att_masks=None)
    assert jnp.allclose(out, ref, atol=TOL, rtol=TOL), "no-mask mismatch"

    out_m = jax.block_until_ready(attention_forward(x, w, bias, att_masks=masks))
    ref_m = _reference(x, w, bias, att_masks=masks)
    assert jnp.allclose(out_m, ref_m, atol=TOL, rtol=TOL), "mask mismatch"

    # Case 2: B not divisible by TB -> exercises the cdiv grid (2 steps, partial last block).
    B2 = 50
    x_big = jax.random.normal(k_x2, (B2, N, D), dtype=jnp.float32)
    masks_big = (jax.random.uniform(k_m2, (B2, N)) > 0.2).astype(jnp.float32)
    masks_big = masks_big.at[:, 0].set(1.0)

    out_big = jax.block_until_ready(attention_forward(x_big, w, bias, att_masks=masks_big))
    ref_big = _reference(x_big, w, bias, att_masks=masks_big)
    assert jnp.allclose(out_big, ref_big, atol=TOL, rtol=TOL), "tiled mask mismatch"

    out_big_nm = jax.block_until_ready(attention_forward(x_big, w, bias, att_masks=None))
    ref_big_nm = _reference(x_big, w, bias, att_masks=None)
    assert jnp.allclose(out_big_nm, ref_big_nm, atol=TOL, rtol=TOL), "tiled no-mask mismatch"

    print("KERNEL_OK")
</pallas_src>

<mosaic_0001>
module attributes {stable_mosaic.version = 11 : i64} {
  func.func @kernel(%arg0: i32, %arg1: memref<8x256xf32, #tpu.memory_space<vmem>>, %arg2: memref<256x8xf32, #tpu.memory_space<vmem>>, %arg3: memref<8x32xf32, #tpu.memory_space<vmem>>) attributes {dimension_semantics = [#tpu.dimension_semantics<parallel>], iteration_bounds = array<i64: 1>, scalar_prefetch = 0 : i64, scratch_operands = 0 : i64, tpu.core_type = #tpu.core_type<tc>, window_params = [{transform_indices = @transform_0, window_bounds = array<i64: 8, 256>}, {pipeline_mode = #tpu.pipeline_mode<synchronous>, transform_indices = @transform_1, window_bounds = array<i64: 256, 8>}, {transform_indices = @transform_2, window_bounds = array<i64: 8, 32>}]} {
    %c0 = arith.constant 0 : index
    %c0_0 = arith.constant 0 : index
    %0 = vector.load %arg1[%c0, %c0_0] : memref<8x256xf32, #tpu.memory_space<vmem>>, vector<8x256xf32>
    %1 = math.tanh %0 : vector<8x256xf32>
    %c0_1 = arith.constant 0 : index
    %c0_2 = arith.constant 0 : index
    %2 = vector.load %arg2[%c0_1, %c0_2] : memref<256x8xf32, #tpu.memory_space<vmem>>, vector<256x8xf32>
    %cst = arith.constant dense<0.000000e+00> : vector<8x8xf32>
    %3 = tpu.matmul %1, %2, %cst {dimension_numbers = #tpu.dot_dimension_numbers<[1], [0], [0], [1], [0, 0, 1, 1], [], []>} : vector<8x256xf32>, vector<256x8xf32>, vector<8x8xf32> -> vector<8x8xf32>
    %cst_3 = arith.constant dense<0xFF800000> : vector<8xf32>
    %4 = vector.multi_reduction <maximumf>, %3, %cst_3 [1] : vector<8x8xf32> to vector<8xf32>
    %5 = vector.shape_cast %4 : vector<8xf32> to vector<8x1xf32>
    %6 = vector.broadcast %5 : vector<8x1xf32> to vector<8x8xf32>
    %7 = arith.subf %3, %6 : vector<8x8xf32>
    %8 = math.exp %7 : vector<8x8xf32>
    %cst_4 = arith.constant dense<0.000000e+00> : vector<8xf32>
    %9 = vector.multi_reduction <add>, %8, %cst_4 [1] : vector<8x8xf32> to vector<8xf32>
    %10 = vector.shape_cast %9 : vector<8xf32> to vector<8x1xf32>
    %11 = tpu.reciprocal %10 {approx = true} : vector<8x1xf32> -> vector<8x1xf32>
    %12 = vector.extract_strided_slice %8 {offsets = [0, 0], sizes = [8, 1], strides = [1, 1]} : vector<8x8xf32> to vector<8x1xf32>
    %13 = vector.extract_strided_slice %0 {offsets = [0, 0], sizes = [8, 32], strides = [1, 1]} : vector<8x256xf32> to vector<8x32xf32>
    %14 = vector.broadcast %12 : vector<8x1xf32> to vector<8x32xf32>
    %15 = arith.mulf %14, %13 : vector<8x32xf32>
    %16 = vector.extract_strided_slice %8 {offsets = [0, 1], sizes = [8, 1], strides = [1, 1]} : vector<8x8xf32> to vector<8x1xf32>
    %17 = vector.extract_strided_slice %0 {offsets = [0, 32], sizes = [8, 32], strides = [1, 1]} : vector<8x256xf32> to vector<8x32xf32>
    %18 = vector.broadcast %16 : vector<8x1xf32> to vector<8x32xf32>
    %19 = arith.mulf %18, %17 : vector<8x32xf32>
    %20 = arith.addf %15, %19 : vector<8x32xf32>
    %21 = vector.extract_strided_slice %8 {offsets = [0, 2], sizes = [8, 1], strides = [1, 1]} : vector<8x8xf32> to vector<8x1xf32>
    %22 = vector.extract_strided_slice %0 {offsets = [0, 64], sizes = [8, 32], strides = [1, 1]} : vector<8x256xf32> to vector<8x32xf32>
    %23 = vector.broadcast %21 : vector<8x1xf32> to vector<8x32xf32>
    %24 = arith.mulf %23, %22 : vector<8x32xf32>
    %25 = arith.addf %20, %24 : vector<8x32xf32>
    %26 = vector.extract_strided_slice %8 {offsets = [0, 3], sizes = [8, 1], strides = [1, 1]} : vector<8x8xf32> to vector<8x1xf32>
    %27 = vector.extract_strided_slice %0 {offsets = [0, 96], sizes = [8, 32], strides = [1, 1]} : vector<8x256xf32> to vector<8x32xf32>
    %28 = vector.broadcast %26 : vector<8x1xf32> to vector<8x32xf32>
    %29 = arith.mulf %28, %27 : vector<8x32xf32>
    %30 = arith.addf %25, %29 : vector<8x32xf32>
    %31 = vector.extract_strided_slice %8 {offsets = [0, 4], sizes = [8, 1], strides = [1, 1]} : vector<8x8xf32> to vector<8x1xf32>
    %32 = vector.extract_strided_slice %0 {offsets = [0, 128], sizes = [8, 32], strides = [1, 1]} : vector<8x256xf32> to vector<8x32xf32>
    %33 = vector.broadcast %31 : vector<8x1xf32> to vector<8x32xf32>
    %34 = arith.mulf %33, %32 : vector<8x32xf32>
    %35 = arith.addf %30, %34 : vector<8x32xf32>
    %36 = vector.extract_strided_slice %8 {offsets = [0, 5], sizes = [8, 1], strides = [1, 1]} : vector<8x8xf32> to vector<8x1xf32>
    %37 = vector.extract_strided_slice %0 {offsets = [0, 160], sizes = [8, 32], strides = [1, 1]} : vector<8x256xf32> to vector<8x32xf32>
    %38 = vector.broadcast %36 : vector<8x1xf32> to vector<8x32xf32>
    %39 = arith.mulf %38, %37 : vector<8x32xf32>
    %40 = arith.addf %35, %39 : vector<8x32xf32>
    %41 = vector.extract_strided_slice %8 {offsets = [0, 6], sizes = [8, 1], strides = [1, 1]} : vector<8x8xf32> to vector<8x1xf32>
    %42 = vector.extract_strided_slice %0 {offsets = [0, 192], sizes = [8, 32], strides = [1, 1]} : vector<8x256xf32> to vector<8x32xf32>
    %43 = vector.broadcast %41 : vector<8x1xf32> to vector<8x32xf32>
    %44 = arith.mulf %43, %42 : vector<8x32xf32>
    %45 = arith.addf %40, %44 : vector<8x32xf32>
    %46 = vector.extract_strided_slice %8 {offsets = [0, 7], sizes = [8, 1], strides = [1, 1]} : vector<8x8xf32> to vector<8x1xf32>
    %47 = vector.extract_strided_slice %0 {offsets = [0, 224], sizes = [8, 32], strides = [1, 1]} : vector<8x256xf32> to vector<8x32xf32>
    %48 = vector.broadcast %46 : vector<8x1xf32> to vector<8x32xf32>
    %49 = arith.mulf %48, %47 : vector<8x32xf32>
    %50 = arith.addf %45, %49 : vector<8x32xf32>
    %51 = vector.broadcast %11 : vector<8x1xf32> to vector<8x32xf32>
    %52 = arith.mulf %50, %51 : vector<8x32xf32>
    %c0_5 = arith.constant 0 : index
    %c0_6 = arith.constant 0 : index
    %53 = vector.load %arg3[%c0_5, %c0_6] : memref<8x32xf32, #tpu.memory_space<vmem>>, vector<8x32xf32>
    tpu.vector_store %arg3[%c0_5, %c0_6], %52 {strides = array<i32>} : memref<8x32xf32, #tpu.memory_space<vmem>>, vector<8x32xf32>,
    return
  }
  func.func @transform_0(%arg0: i32) -> (i32, i32) {
    %c0_i32 = arith.constant 0 : i32
    %c0_i32_0 = arith.constant 0 : i32
    return %arg0, %c0_i32 : i32, i32
  }
  func.func @transform_1(%arg0: i32) -> (i32, i32) {
    %c0_i32 = arith.constant 0 : i32
    %c0_i32_0 = arith.constant 0 : i32
    %c0_i32_1 = arith.constant 0 : i32
    return %c0_i32, %c0_i32_0 : i32, i32
  }
  func.func @transform_2(%arg0: i32) -> (i32, i32) {
    %c0_i32 = arith.constant 0 : i32
    %c0_i32_0 = arith.constant 0 : i32
    return %arg0, %c0_i32 : i32, i32
  }
}

</mosaic_0001>

<bundles_post_ra>
// kernel: tpu_custom_call.1
= control target key start
LH: loop header
LB: loop body
LE: loop exit
PB: predicated region body
PF: predicated region fallthrough
CT: control target
= control target key end

     0   :  { %7 = vsyncpa [#allocation3], 0  ;;  %v394_v35 = vmov 1983009808   ;;  %v61_v37 = vlaneseq  ;;  %vm146_vm0 = vcmask 64512   ;;  %s402_s24 = smov 64   ;;  %s563_s0 = inlined_call_operand.vmem [shape: f32[2,256], index: 0, kind: input, shape index: {}]   ;;  %s564_s1 = inlined_call_operand.vmem [shape: f32[256,8], index: 1, kind: input, shape index: {}]   ;;  %s565_s2 = inlined_call_operand.hbm [shape: f32[2,32], index: 2, kind: output, shape index: {}]  }
   0x1   :  { %v36_v0 = vld [vmem:[%s564_s1 + $0x80] sm:$0xff]  ;;  %v37_v1 = vld [vmem:[%s564_s1 + $0x88] sm:$0xff]  ;;  %v38_v5 = vld [vmem:[%s564_s1 + $0x90] sm:$0xff]  ;;  %v59_v36 = vunpack.c.l.s4 %v394_v35  ;;  %s405_s25 = smov 32   ;;  %vm248_vm1 = vcmask 261120  }
   0x2   :  { %v301_v2 = vpack.c.bf16 %v37_v1, %v36_v0  ;;  %v20_v3 = vld [vmem:[%s564_s1] sm:$0xff]  ;;  %v21_v4 = vld [vmem:[%s564_s1 + $0x8] sm:$0xff]  ;;  %v39_v7 = vld [vmem:[%s564_s1 + $0x98] sm:$0xff]  ;;  %v62_v45 = vshrl.u32 %v61_v37, 7 }
   0x3   :  { %v303_v6 = vpack.c.bf16 %v21_v4, %v20_v3  ;;  %v22_v8 = vld [vmem:[%s564_s1 + $0x10] sm:$0xff]  ;;  %v23_v9 = vld [vmem:[%s564_s1 + $0x18] sm:$0xff]  ;;  %v305_v10 = vpack.c.bf16 %v39_v7, %v38_v5  ;;  %v40_v11 = vld [vmem:[%s564_s1 + $0xa0] sm:$0xff]  ;;  %v60_v44 = vunpack.c.0.s8 %v59_v36 }
   0x4   :  { %302 = vmatprep.subr.bf16.mxu0 %v301_v2  ;;  %v41_v12 = vld [vmem:[%s564_s1 + $0xa8] sm:$0xff]  ;;  %v307_v13 = vpack.c.bf16 %v23_v9, %v22_v8  ;;  %v24_v15 = vld [vmem:[%s564_s1 + $0x20] sm:$0xff]  ;;  %v42_v17 = vld [vmem:[%s564_s1 + $0xb0] sm:$0xff]  ;;  %v395_v8 = vmov 0   ;;  %v396_v9 = vmov 2  }
   0x5   :  { %304 = vmatpush3.bf16.msra.mxu0 %v303_v6  ;;  %v309_v14 = vpack.c.bf16 %v41_v12, %v40_v11  ;;  %v25_v16 = vld [vmem:[%s564_s1 + $0x28] sm:$0xff]  ;;  %v43_v18 = vld [vmem:[%s564_s1 + $0xb8] sm:$0xff]  ;;  %v26_v21 = vld [vmem:[%s564_s1 + $0x30] sm:$0xff]  ;;  %v63_v53 = vsub.s32 %v60_v44, %v62_v45  ;;  %347 = vset.pattern.permute.xlu1 %v395_v8 }
   0x6   :  { %306 = vmatprep.subr.bf16.mxu0 %v305_v10  ;;  %v311_v19 = vpack.c.bf16 %v25_v16, %v24_v15  ;;  %v313_v20 = vpack.c.bf16 %v43_v18, %v42_v17  ;;  %v27_v22 = vld [vmem:[%s564_s1 + $0x38] sm:$0xff]  ;;  %v44_v23 = vld [vmem:[%s564_s1 + $0xc0] sm:$0xff]  ;;  %v45_v24 = vld [vmem:[%s564_s1 + $0xc8] sm:$0xff]  ;;  %349 = vset.pattern.permute.xlu0 %v396_v9  ;;  %v397_v15 = vmov 1   ;;  %v398_v18 = vmov 3  }
   0x7   :  { %v480_v25 = vld [vmem:[%s563_s0] sm:$0xf]  ;;  %v485_v26 = vld [vmem:[%s563_s0 + $0x4] sm:$0xf]  ;;  %v490_v27 = vld [vmem:[%s563_s0 + $0x8] sm:$0xf]  ;;  %v315_v28 = vpack.c.bf16 %v27_v22, %v26_v21  ;;  %v317_v30 = vpack.c.bf16 %v45_v24, %v44_v23 }
   0x8   :  { %v495_v29 = vld [vmem:[%s563_s0 + $0xc] sm:$0xf]  ;;  %358 = vtanh.f32 %v480_v25  ;;  %v28_v31 = vld [vmem:[%s564_s1 + $0x40] sm:$0xff]  ;;  %v46_v33 = vld [vmem:[%s564_s1 + $0xd0] sm:$0xff]  ;;  %v166_v16 = vcombine.low %v480_v25, %v485_v26  ;;  %v399_v21 = vmov 4   ;;  %v401_v23 = vmov 5  }
   0x9   :  { %308 = vmatpush3.bf16.msra.mxu0 %v307_v13  ;;  %v29_v32 = vld [vmem:[%s564_s1 + $0x48] sm:$0xff]  ;;  %360 = vtanh.f32 %v485_v26  ;;  %v47_v34 = vld [vmem:[%s564_s1 + $0xd8] sm:$0xff]  ;;  %v30_v40 = vld [vmem:[%s564_s1 + $0x50] sm:$0xff]  ;;  %v167_v17 = vcombine.low %v490_v27, %v495_v29  ;;  %v403_v24 = vmov 7   ;;  %v404_v25 = vmov 6  }
   0xa   :  { %310 = vmatprep.subr.bf16.mxu0 %v309_v14  ;;  %362 = vtanh.f32 %v490_v27  ;;  %v319_v38 = vpack.c.bf16 %v29_v32, %v28_v31  ;;  %v321_v39 = vpack.c.bf16 %v47_v34, %v46_v33  ;;  %v31_v41 = vld [vmem:[%s564_s1 + $0x58] sm:$0xff]  ;;  %v48_v42 = vld [vmem:[%s564_s1 + $0xe0] sm:$0xff]  ;;  %v49_v43 = vld [vmem:[%s564_s1 + $0xe8] sm:$0xff] }
   0xb   :  { %364 = vtanh.f32 %v495_v29  ;;  %v323_v46 = vpack.c.bf16 %v31_v41, %v30_v40  ;;  %v325_v47 = vpack.c.bf16 %v49_v43, %v48_v42  ;;  %v32_v48 = vld [vmem:[%s564_s1 + $0x60] sm:$0xff]  ;;  %v33_v49 = vld [vmem:[%s564_s1 + $0x68] sm:$0xff]  ;;  %v50_v51 = vld [vmem:[%s564_s1 + $0xf0] sm:$0xff] }
   0xc   :  { %v51_v52 = vld [vmem:[%s564_s1 + $0xf8] sm:$0xff]  ;;  %v327_v56 = vpack.c.bf16 %v33_v49, %v32_v48  ;;  %v34_v60 = vld [vmem:[%s564_s1 + $0x70] sm:$0xff] }
   0xd   :  { %312 = vmatpush3.bf16.msra.mxu0 %v311_v19  ;;  %v329_v59 = vpack.c.bf16 %v51_v52, %v50_v51  ;;  %v35_v61 = vld [vmem:[%s564_s1 + $0x78] sm:$0xff]  ;;  %v174_v19 = vrot.slane %v166_v16, %v63_v53  ;;  %s400_s1 = smov 96  }
   0xe   :  { %314 = vmatprep.subr.bf16.mxu0 %v313_v20  ;;  %v331_v0 = vpack.c.bf16 %v35_v61, %v34_v60  ;;  %v181_v20 = vrot.slane %v167_v17, %v63_v53 }
  0x10   :  { %v182_v22 = vcombine.low %v174_v19, %v181_v20  ;;  %v216_v26 = vcombine.high %v174_v19, %v181_v20 }
  0x11   :  { %316 = vmatpush3.bf16.msra.mxu0 %v315_v28 }
  0x12   :  { %318 = vmatprep.subr.bf16.mxu0 %v317_v30  ;;  %v359_v50 = vpop.eup %358 }
  0x13   :  { %v361_v54 = vpop.eup %360 }
  0x14   :  { %v363_v55 = vpop.eup %362  ;;  %v56_v57 = vcombine.low %v359_v50, %v361_v54 }
  0x15   :  { %320 = vmatpush3.bf16.msra.mxu0 %v319_v38  ;;  %v365_v58 = vpop.eup %364 }
  0x16   :  { %322 = vmatprep.subr.bf16.mxu0 %v321_v39  ;;  %v57_v62 = vcombine.low %v363_v55, %v365_v58  ;;  %v64_v63 = vrot.slane %v56_v57, %v63_v53 }
  0x18   :  { %v71_v1 = vrot.slane %v57_v62, %v63_v53 }
  0x19   :  { %324 = vmatpush3.bf16.msra.mxu0 %v323_v46 }
  0x1a   :  { %326 = vmatprep.subr.bf16.mxu0 %v325_v47  ;;  %v73_v2 = vcombine.high %v64_v63, %v71_v1  ;;  %v72_v3 = vcombine.low %v64_v63, %v71_v1 }
  0x1c   :  { %140 = vmatprep.mubr.f32.mxu0 %v73_v2 }
  0x1d   :  { %328 = vmatpush3.bf16.msra.mxu0 %v327_v56 }
  0x1e   :  { %330 = vmatprep.subr.bf16.mxu0 %v329_v59 }
  0x21   :  { %332 = vmatpush3.bf16.msra.mxu0 %v331_v0 }
  0x24   :  { %141 = vmatmul.mubr.f32.vlgmr.msra.gmra.mrb[0].mxu0 %v72_v3 }
  0xf7   :  { %v298_v4 = vpop.f32.mrb[0].mxu0 }
  0xf8   :  { %v299_v5 = vpop.f32.mrb[1].mxu0 }
  0xf9   :  { %v300_v6 = vadd.f32 %v299_v5, %v298_v4 }
  0xfb   :  { %v147_v7 = vsel %vm146_vm0, %v300_v6, -inf }
  0xfc   :  { %148 = vmax.xlane.f32.xlu0 %v147_v7 }
 0x189   :  { %v149_v10 = vpop.xlane.xlu0 %148 }
 0x18a   :  { %v150_v11 = vsub.f32 %v300_v6, %v149_v10 }
 0x18c   :  { %v151_v12 = vmul.f32 1.442695, %v150_v11 }
 0x18e   :  { %366 = vpow2.f32 %v151_v12 }
 0x198   :  { %v367_v13 = vpop.eup %366 }
 0x199   :  { %159 = vperm.xlu1 %347, %v367_v13   ;;  %v153_v14 = vsel %vm146_vm0, %v367_v13, 0.0 }
 0x19a   :  { %154 = vadd.xlane.f32.xlu0 %v153_v14 }
 0x19d   :  { %348 = vset.pattern.permute.xlu1 %v397_v15 }
 0x19e   :  { %186 = vperm.xlu1 %348, %v367_v13  }
 0x1a2   :  { %350 = vset.pattern.permute.xlu1 %v398_v18 }
 0x1a3   :  { %204 = vperm.xlu1 %350, %v367_v13  }
 0x1a7   :  { %351 = vset.pattern.permute.xlu1 %v399_v21 }
 0x1a8   :  { %213 = vperm.xlu1 %351, %v367_v13  }
 0x1ac   :  { %189 = vrot.lane.b32.xlu1 %v182_v22, %s400_s1 }
 0x1ad   :  { %352 = vset.pattern.permute.xlu1 %v401_v23 }
 0x1b0   :  { %221 = vperm.xlu1 %352, %v367_v13   ;;  %195 = vperm.xlu0 %349, %v367_v13  }
 0x1b4   :  { %198 = vrot.lane.b32.xlu1 %v182_v22, %s402_s24  ;;  %355 = vset.pattern.permute.xlu0 %v403_v24 }
 0x1b5   :  { %353 = vset.pattern.permute.xlu1 %v404_v25 }
 0x1b8   :  { %230 = vperm.xlu1 %353, %v367_v13  }
 0x1bc   :  { %207 = vrot.lane.b32.xlu1 %v182_v22, %s405_s25 }
 0x1bd   :  { %354 = vset.pattern.permute.xlu1 %v403_v24 }
 0x1c0   :  { %239 = vperm.xlu1 %354, %v367_v13  }
 0x1c4   :  { %224 = vrot.lane.b32.xlu1 %v216_v26, %s400_s1 }
 0x1c8   :  { %233 = vrot.lane.b32.xlu1 %v216_v26, %s402_s24 }
 0x1cc   :  { %242 = vrot.lane.b32.xlu1 %v216_v26, %s405_s25 }
 0x218   :  { %v160_v27 = vpop.permute.xlu1 %159 }
 0x219   :  { %v184_v39 = vmul.f32 %v182_v22, %v160_v27 }
 0x21d   :  { %v187_v28 = vpop.permute.xlu1 %186 }
 0x222   :  { %v205_v29 = vpop.permute.xlu1 %204 }
 0x227   :  { %v214_v30 = vpop.permute.xlu1 %213  ;;  %v155_v35 = vpop.xlane.xlu0 %154 }
 0x228   :  { %368 = vrcp.f32 %v155_v35  ;;  %v218_v47 = vmul.f32 %v216_v26, %v214_v30 }
 0x22b   :  { %v190_v31 = vpop.permute.xlu1 %189 }
 0x22c   :  { %v192_v37 = vmul.f32 %v190_v31, %v187_v28 }
 0x22e   :  { %v193_v42 = vadd.f32 %v192_v37, %v184_v39 }
 0x22f   :  { %v222_v32 = vpop.permute.xlu1 %221  ;;  %v196_v38 = vpop.permute.xlu0 %195 }
 0x232   :  { %v369_v57 = vpop.eup %368 }
 0x233   :  { %v199_v33 = vpop.permute.xlu1 %198 }
 0x234   :  { %v201_v40 = vmul.f32 %v199_v33, %v196_v38 }
 0x236   :  { %v202_v44 = vadd.f32 %v201_v40, %v193_v42 }
 0x237   :  { %v231_v34 = vpop.permute.xlu1 %230 }
 0x23b   :  { %v208_v36 = vpop.permute.xlu1 %207 }
 0x23c   :  { %v210_v43 = vmul.f32 %v208_v36, %v205_v29 }
 0x23e   :  { %v211_v46 = vadd.f32 %v210_v43, %v202_v44 }
 0x23f   :  { %v240_v41 = vpop.permute.xlu1 %239 }
 0x240   :  { %v219_v50 = vadd.f32 %v218_v47, %v211_v46 }
 0x243   :  { %v225_v45 = vpop.permute.xlu1 %224 }
 0x244   :  { %v227_v48 = vmul.f32 %v225_v45, %v222_v32 }
 0x246   :  { %v228_v52 = vadd.f32 %v227_v48, %v219_v50 }
 0x247   :  { %v234_v49 = vpop.permute.xlu1 %233 }
 0x248   :  { %v236_v51 = vmul.f32 %v234_v49, %v231_v34 }
 0x24a   :  { %v237_v54 = vadd.f32 %v236_v51, %v228_v52 }
 0x24b   :  { %v243_v53 = vpop.permute.xlu1 %242 }
 0x24c   :  { %v245_v55 = vmul.f32 %v243_v53, %v240_v41 }
 0x24e   :  { %v246_v56 = vadd.f32 %v245_v55, %v237_v54 }
 0x250   :  { %v247_v58 = vmul.f32 %v369_v57, %v246_v56 }
 0x252   :  { %249 = vst.msk [vmem:[#allocation2] sm:$0xff] %vm248_vm1, %v247_v58 }
 0x253   :  { %254 = vsyncadd [#allocation3], 96  ;;  %s406_s26 = smov [#allocation2]  }
 0x254   :  { %s255_s27 = sshll.u32 %s406_s26, 4  ;;  %s256_s27 = int_to_ptr.vmem [resolvable:$true] %s255_s27 }
 0x255   :  { %s370_s28 = scalar_lea.vmem %s256_s27, 32  ;;  %s374_s29 = scalar_lea.vmem %s256_s27, 128 }
 0x256   :  { %p371_p0 = scmp.ne.s32.totalorder %s256_s27, %s370_s28  ;;  %p375_p1 = scmp.lt.s32.totalorder %s256_s27, %s256_s27 }
 0x257   :  { %p376_p2 = scmp.lt.s32.totalorder %s374_s29, %s370_s28 }
 0x259   :  { %p377_p3 = por %p376_p2, %p375_p1 }
 0x25b   :  { %p378_p4 = pnand %p377_p3, %p371_p0 }
 0x25d   :  { %381 = shalt.err (!%p378_p4)
}
 0x25e   :  { %s382_s3 = scalar_lea.hbm %s565_s2, 32 }
 0x25f   :  { %p383_p5 = scmp.ne.s32.totalorder %s565_s2, %s382_s3  ;;  %p386_p6 = scmp.lt.u32.totalorder %s382_s3, %s565_s2 }
 0x261   :  { %p388_p7 = pnand %p386_p6, %p383_p5 }
 0x263   :  { %391 = shalt.err (!%p388_p7)
}
 0x264   :  { %s407_s8 = smov 2  }
 0x265   :  { %261 = dma.vmem_to_hbm [thread:$0]  %s256_s27, 32, %s565_s2, [#allocation3], %s405_s25, %s405_s25, %s407_s8  }
 0x266   :  { %392 = dma.done.wait [#allocation3], 128  }
 0x267   :  { %393 = vsyncadd [#allocation3], 4294967168 }
 0x268   :  { %265 = vsyncpa [#allocation3], 1 }

</bundles_post_ra>
